<compile_context>
chip_gen: v7x
topology: tpu7x:2x2x1
jax: 0.10.0
libtpu: 0.0.40
codegen_flags: <defaults>
</compile_context>

<pallas_src>
import functools

import jax
import jax.numpy as jnp
from jax.experimental import pallas as pl
from jax.experimental.pallas import tpu as pltpu


def _round_up(v, m):
    return ((v + m - 1) // m) * m


def _conv_bn_kernel(x_ref, w_ref, shift_ref, o_ref, *, tap_offsets, out_width):
    """Fused conv + BN for one image.

    x_ref:     (C, S)          f32  -- padded image, (H, W) flattened into lanes
    w_ref:     (KH*KW, OCP, C) bf16 -- BN-scale-folded weights, one (OCP, C) slab per tap
    shift_ref: (OCP, 1)        f32  -- folded BN shift
    o_ref:     (OCP, OUT_W)    f32  -- lane-dense "wide" output (OUT_W % 128 == 0)
    """
    acc = jnp.zeros(o_ref.shape, dtype=jnp.float32)
    for t, off in enumerate(tap_offsets):
        # Static lane-offset window of the resident tile (in-kernel "im2col"); cast to
        # bf16 so the matmul runs on the bf16 MXU path with f32 accumulation.
        win = x_ref[:, off:off + out_width].astype(jnp.bfloat16)       # (C, OUT_W)
        acc = acc + jnp.dot(w_ref[t], win,
                            preferred_element_type=jnp.float32)        # (OCP, OUT_W)
    o_ref[...] = acc + shift_ref[...]                                   # f32 epilogue


@functools.partial(jax.jit, static_argnames=("stride", "padding", "dilation"))
def basic_conv2d(x, weight, gamma, beta, running_mean, running_var,
                 stride=(1, 1), padding=(0, 0), dilation=(1, 1), eps=1e-5):
    n, c, h, w = x.shape
    oc, _, kh, kw = weight.shape
    sh, sw = stride
    ph, pw = padding
    dh, dw = dilation

    hp, wp = h + 2 * ph, w + 2 * pw
    oh = (hp - dh * (kh - 1) - 1) // sh + 1
    ow = (wp - dw * (kw - 1) - 1) // sw + 1

    # ---- fold eval-mode BatchNorm: scale goes into the weights, shift into the epilogue ----
    inv_std = jax.lax.rsqrt(running_var.astype(jnp.float32) + eps)
    scale = gamma.astype(jnp.float32) * inv_std
    shift = beta.astype(jnp.float32) - running_mean.astype(jnp.float32) * scale

    ocp = _round_up(oc, 8)                      # sublane-align OC (output second-minor dim)
    w_f = weight.astype(jnp.float32) * scale[:, None, None, None]       # (OC, C, KH, KW)
    w_taps = jnp.transpose(w_f, (2, 3, 0, 1)).reshape(kh * kw, oc, c)   # (T, OC, C)
    w_taps = jnp.pad(w_taps, ((0, 0), (0, ocp - oc), (0, 0))).astype(jnp.bfloat16)
    shift_col = jnp.pad(shift, (0, ocp - oc)).reshape(ocp, 1)

    # ---- input: keep NCHW (no transpose), pad spatially, flatten (H, W) into lanes ----
    xp = jnp.pad(x, ((0, 0), (0, 0), (ph, ph), (pw, pw)))               # (N, C, HP, WP)
    flat = hp * wp
    rows_needed = (oh - 1) * sh + 1             # padded-input rows carrying valid outputs
    cols_needed = (ow - 1) * sw + 1
    out_w = _round_up(rows_needed * wp, 128)    # lane-dense "wide" output width
    max_off = (kh - 1) * dh * wp + (kw - 1) * dw
    s_x = _round_up(max(flat, max_off + out_w), 128)
    x_flat = jnp.pad(xp.reshape(n, c, flat),
                     ((0, 0), (0, 0), (0, s_x - flat))).astype(jnp.float32)

    tap_offsets = tuple(i * dh * wp + j * dw for i in range(kh) for j in range(kw))

    kernel = functools.partial(_conv_bn_kernel,
                               tap_offsets=tap_offsets, out_width=out_w)

    out_wide = pl.pallas_call(
        kernel,
        out_shape=jax.ShapeDtypeStruct((n, ocp, out_w), jnp.float32),
        grid_spec=pltpu.PrefetchScalarGridSpec(
            num_scalar_prefetch=0,
            grid=(n,),                          # one step per image
            in_specs=[
                pl.BlockSpec((None, c, s_x), lambda b: (b, 0, 0)),
                pl.BlockSpec((kh * kw, ocp, c), lambda b: (0, 0, 0)),
                pl.BlockSpec((ocp, 1), lambda b: (0, 0)),
            ],
            out_specs=pl.BlockSpec((None, ocp, out_w), lambda b: (b, 0, 0)),
        ),
        compiler_params=pltpu.CompilerParams(
            dimension_semantics=("parallel",)),   # megacore shard on v7x
    )(x_flat, w_taps, shift_col)

    # Wide-output column j corresponds to flattened padded-input position j; the valid
    # conv outputs sit at j = (oh*sh)*WP + ow*sw.  Extract with cheap slices and a free
    # reshape -- the result is already NCHW, no transpose needed.
    y = out_wide[:, :oc, :rows_needed * wp]
    y = y.reshape(n, oc, rows_needed, wp)[:, :, ::sh, :cols_needed:sw]   # (N, OC, OH, OW)
    return y


def _reference(x, weight, gamma, beta, running_mean, running_var,
               stride, padding, dilation, eps=1e-5):
    y = jax.lax.conv_general_dilated(
        x, weight, window_strides=stride,
        padding=[(padding[0], padding[0]), (padding[1], padding[1])],
        rhs_dilation=dilation,
        dimension_numbers=("NCHW", "OIHW", "NCHW"))
    inv_std = jax.lax.rsqrt(running_var + eps)
    scale = (gamma * inv_std)[None, :, None, None]
    shift = (beta - running_mean * gamma * inv_std)[None, :, None, None]
    return y * scale + shift


if __name__ == "__main__":
    key = jax.random.PRNGKey(0)
    k_x, k_w, k_g, k_b, k_m, k_v = jax.random.split(key, 6)

    # BasicConv2d(in_planes=4, out_planes=8, kernel_size=3, stride=1,
    #             padding=(1, 1), dilation=1)
    N, C, H, W = 2, 4, 16, 16
    OC, KH, KW = 8, 3, 3
    stride, padding, dilation = (1, 1), (1, 1), (1, 1)

    x = jax.random.normal(k_x, (N, C, H, W), dtype=jnp.float32)
    weight = jax.random.normal(k_w, (OC, C, KH, KW), dtype=jnp.float32) * 0.1
    gamma = jax.random.normal(k_g, (OC,), dtype=jnp.float32) * 0.1 + 1.0
    beta = jax.random.normal(k_b, (OC,), dtype=jnp.float32) * 0.1
    running_mean = jax.random.normal(k_m, (OC,), dtype=jnp.float32) * 0.1
    running_var = jax.nn.softplus(jax.random.normal(k_v, (OC,), dtype=jnp.float32)) + 0.5

    out = basic_conv2d(x, weight, gamma, beta, running_mean, running_var,
                       stride=stride, padding=padding, dilation=dilation)
    out = jax.block_until_ready(out)

    ref = _reference(x, weight, gamma, beta, running_mean, running_var,
                     stride, padding, dilation)
    assert out.shape == (N, OC, H, W), out.shape
    err = float(jnp.max(jnp.abs(out - ref)))
    # bf16 MXU inputs with f32 accumulation -> loosened tolerance vs pure f32.
    assert jnp.allclose(out, ref, atol=3e-2, rtol=3e-2), err

    print("KERNEL_OK")
</pallas_src>

<mosaic_0001>
module attributes {stable_mosaic.version = 11 : i64} {
  func.func @_conv_bn_kernel(%arg0: i32, %arg1: memref<1x4x512xf32, #tpu.memory_space<vmem>>, %arg2: memref<9x8x4xbf16, #tpu.memory_space<vmem>>, %arg3: memref<8x1xf32, #tpu.memory_space<vmem>>, %arg4: memref<1x8x384xf32, #tpu.memory_space<vmem>>) attributes {dimension_semantics = [#tpu.dimension_semantics<parallel>], iteration_bounds = array<i64: 2>, scalar_prefetch = 0 : i64, scratch_operands = 0 : i64, tpu.core_type = #tpu.core_type<tc>, window_params = [{transform_indices = @transform_0, window_bounds = array<i64: 1, 4, 512>}, {pipeline_mode = #tpu.pipeline_mode<synchronous>, transform_indices = @transform_1, window_bounds = array<i64: 9, 8, 4>}, {pipeline_mode = #tpu.pipeline_mode<synchronous>, transform_indices = @transform_2, window_bounds = array<i64: 8, 1>}, {transform_indices = @transform_3, window_bounds = array<i64: 1, 8, 384>}]} {
    %cst = arith.constant 0.000000e+00 : f32
    %0 = vector.broadcast %cst : f32 to vector<8x384xf32>
    %c0 = arith.constant 0 : index
    %c0_0 = arith.constant 0 : index
    %c0_1 = arith.constant 0 : index
    %1 = vector.load %arg1[%c0, %c0_0, %c0_1] : memref<1x4x512xf32, #tpu.memory_space<vmem>>, vector<1x4x384xf32>
    %2 = vector.shape_cast %1 : vector<1x4x384xf32> to vector<4x384xf32>
    %3 = arith.truncf %2 : vector<4x384xf32> to vector<4x384xbf16>
    %c0_2 = arith.constant 0 : index
    %c0_3 = arith.constant 0 : index
    %c0_4 = arith.constant 0 : index
    %4 = vector.load %arg2[%c0_2, %c0_3, %c0_4] : memref<9x8x4xbf16, #tpu.memory_space<vmem>>, vector<1x8x4xbf16>
    %5 = vector.shape_cast %4 : vector<1x8x4xbf16> to vector<8x4xbf16>
    %cst_5 = arith.constant dense<0.000000e+00> : vector<8x384xf32>
    %6 = tpu.matmul %5, %3, %cst_5 {dimension_numbers = #tpu.dot_dimension_numbers<[1], [0], [0], [1], [0, 0, 1, 1], [], []>} : vector<8x4xbf16>, vector<4x384xbf16>, vector<8x384xf32> -> vector<8x384xf32>
    %7 = arith.addf %0, %6 : vector<8x384xf32>
    %c0_6 = arith.constant 0 : index
    %c0_7 = arith.constant 0 : index
    %c1 = arith.constant 1 : index
    %8 = vector.load %arg1[%c0_6, %c0_7, %c1] : memref<1x4x512xf32, #tpu.memory_space<vmem>>, vector<1x4x384xf32>
    %9 = vector.shape_cast %8 : vector<1x4x384xf32> to vector<4x384xf32>
    %10 = arith.truncf %9 : vector<4x384xf32> to vector<4x384xbf16>
    %c1_8 = arith.constant 1 : index
    %c0_9 = arith.constant 0 : index
    %c0_10 = arith.constant 0 : index
    %11 = vector.load %arg2[%c1_8, %c0_9, %c0_10] : memref<9x8x4xbf16, #tpu.memory_space<vmem>>, vector<1x8x4xbf16>
    %12 = vector.shape_cast %11 : vector<1x8x4xbf16> to vector<8x4xbf16>
    %cst_11 = arith.constant dense<0.000000e+00> : vector<8x384xf32>
    %13 = tpu.matmul %12, %10, %cst_11 {dimension_numbers = #tpu.dot_dimension_numbers<[1], [0], [0], [1], [0, 0, 1, 1], [], []>} : vector<8x4xbf16>, vector<4x384xbf16>, vector<8x384xf32> -> vector<8x384xf32>
    %14 = arith.addf %7, %13 : vector<8x384xf32>
    %c0_12 = arith.constant 0 : index
    %c0_13 = arith.constant 0 : index
    %c2 = arith.constant 2 : index
    %15 = vector.load %arg1[%c0_12, %c0_13, %c2] : memref<1x4x512xf32, #tpu.memory_space<vmem>>, vector<1x4x384xf32>
    %16 = vector.shape_cast %15 : vector<1x4x384xf32> to vector<4x384xf32>
    %17 = arith.truncf %16 : vector<4x384xf32> to vector<4x384xbf16>
    %c2_14 = arith.constant 2 : index
    %c0_15 = arith.constant 0 : index
    %c0_16 = arith.constant 0 : index
    %18 = vector.load %arg2[%c2_14, %c0_15, %c0_16] : memref<9x8x4xbf16, #tpu.memory_space<vmem>>, vector<1x8x4xbf16>
    %19 = vector.shape_cast %18 : vector<1x8x4xbf16> to vector<8x4xbf16>
    %cst_17 = arith.constant dense<0.000000e+00> : vector<8x384xf32>
    %20 = tpu.matmul %19, %17, %cst_17 {dimension_numbers = #tpu.dot_dimension_numbers<[1], [0], [0], [1], [0, 0, 1, 1], [], []>} : vector<8x4xbf16>, vector<4x384xbf16>, vector<8x384xf32> -> vector<8x384xf32>
    %21 = arith.addf %14, %20 : vector<8x384xf32>
    %c0_18 = arith.constant 0 : index
    %c0_19 = arith.constant 0 : index
    %c18 = arith.constant 18 : index
    %22 = vector.load %arg1[%c0_18, %c0_19, %c18] : memref<1x4x512xf32, #tpu.memory_space<vmem>>, vector<1x4x384xf32>
    %23 = vector.shape_cast %22 : vector<1x4x384xf32> to vector<4x384xf32>
    %24 = arith.truncf %23 : vector<4x384xf32> to vector<4x384xbf16>
    %c3 = arith.constant 3 : index
    %c0_20 = arith.constant 0 : index
    %c0_21 = arith.constant 0 : index
    %25 = vector.load %arg2[%c3, %c0_20, %c0_21] : memref<9x8x4xbf16, #tpu.memory_space<vmem>>, vector<1x8x4xbf16>
    %26 = vector.shape_cast %25 : vector<1x8x4xbf16> to vector<8x4xbf16>
    %cst_22 = arith.constant dense<0.000000e+00> : vector<8x384xf32>
    %27 = tpu.matmul %26, %24, %cst_22 {dimension_numbers = #tpu.dot_dimension_numbers<[1], [0], [0], [1], [0, 0, 1, 1], [], []>} : vector<8x4xbf16>, vector<4x384xbf16>, vector<8x384xf32> -> vector<8x384xf32>
    %28 = arith.addf %21, %27 : vector<8x384xf32>
    %c0_23 = arith.constant 0 : index
    %c0_24 = arith.constant 0 : index
    %c19 = arith.constant 19 : index
    %29 = vector.load %arg1[%c0_23, %c0_24, %c19] : memref<1x4x512xf32, #tpu.memory_space<vmem>>, vector<1x4x384xf32>
    %30 = vector.shape_cast %29 : vector<1x4x384xf32> to vector<4x384xf32>
    %31 = arith.truncf %30 : vector<4x384xf32> to vector<4x384xbf16>
    %c4 = arith.constant 4 : index
    %c0_25 = arith.constant 0 : index
    %c0_26 = arith.constant 0 : index
    %32 = vector.load %arg2[%c4, %c0_25, %c0_26] : memref<9x8x4xbf16, #tpu.memory_space<vmem>>, vector<1x8x4xbf16>
    %33 = vector.shape_cast %32 : vector<1x8x4xbf16> to vector<8x4xbf16>
    %cst_27 = arith.constant dense<0.000000e+00> : vector<8x384xf32>
    %34 = tpu.matmul %33, %31, %cst_27 {dimension_numbers = #tpu.dot_dimension_numbers<[1], [0], [0], [1], [0, 0, 1, 1], [], []>} : vector<8x4xbf16>, vector<4x384xbf16>, vector<8x384xf32> -> vector<8x384xf32>
    %35 = arith.addf %28, %34 : vector<8x384xf32>
    %c0_28 = arith.constant 0 : index
    %c0_29 = arith.constant 0 : index
    %c20 = arith.constant 20 : index
    %36 = vector.load %arg1[%c0_28, %c0_29, %c20] : memref<1x4x512xf32, #tpu.memory_space<vmem>>, vector<1x4x384xf32>
    %37 = vector.shape_cast %36 : vector<1x4x384xf32> to vector<4x384xf32>
    %38 = arith.truncf %37 : vector<4x384xf32> to vector<4x384xbf16>
    %c5 = arith.constant 5 : index
    %c0_30 = arith.constant 0 : index
    %c0_31 = arith.constant 0 : index
    %39 = vector.load %arg2[%c5, %c0_30, %c0_31] : memref<9x8x4xbf16, #tpu.memory_space<vmem>>, vector<1x8x4xbf16>
    %40 = vector.shape_cast %39 : vector<1x8x4xbf16> to vector<8x4xbf16>
    %cst_32 = arith.constant dense<0.000000e+00> : vector<8x384xf32>
    %41 = tpu.matmul %40, %38, %cst_32 {dimension_numbers = #tpu.dot_dimension_numbers<[1], [0], [0], [1], [0, 0, 1, 1], [], []>} : vector<8x4xbf16>, vector<4x384xbf16>, vector<8x384xf32> -> vector<8x384xf32>
    %42 = arith.addf %35, %41 : vector<8x384xf32>
    %c0_33 = arith.constant 0 : index
    %c0_34 = arith.constant 0 : index
    %c36 = arith.constant 36 : index
    %43 = vector.load %arg1[%c0_33, %c0_34, %c36] : memref<1x4x512xf32, #tpu.memory_space<vmem>>, vector<1x4x384xf32>
    %44 = vector.shape_cast %43 : vector<1x4x384xf32> to vector<4x384xf32>
    %45 = arith.truncf %44 : vector<4x384xf32> to vector<4x384xbf16>
    %c6 = arith.constant 6 : index
    %c0_35 = arith.constant 0 : index
    %c0_36 = arith.constant 0 : index
    %46 = vector.load %arg2[%c6, %c0_35, %c0_36] : memref<9x8x4xbf16, #tpu.memory_space<vmem>>, vector<1x8x4xbf16>
    %47 = vector.shape_cast %46 : vector<1x8x4xbf16> to vector<8x4xbf16>
    %cst_37 = arith.constant dense<0.000000e+00> : vector<8x384xf32>
    %48 = tpu.matmul %47, %45, %cst_37 {dimension_numbers = #tpu.dot_dimension_numbers<[1], [0], [0], [1], [0, 0, 1, 1], [], []>} : vector<8x4xbf16>, vector<4x384xbf16>, vector<8x384xf32> -> vector<8x384xf32>
    %49 = arith.addf %42, %48 : vector<8x384xf32>
    %c0_38 = arith.constant 0 : index
    %c0_39 = arith.constant 0 : index
    %c37 = arith.constant 37 : index
    %50 = vector.load %arg1[%c0_38, %c0_39, %c37] : memref<1x4x512xf32, #tpu.memory_space<vmem>>, vector<1x4x384xf32>
    %51 = vector.shape_cast %50 : vector<1x4x384xf32> to vector<4x384xf32>
    %52 = arith.truncf %51 : vector<4x384xf32> to vector<4x384xbf16>
    %c7 = arith.constant 7 : index
    %c0_40 = arith.constant 0 : index
    %c0_41 = arith.constant 0 : index
    %53 = vector.load %arg2[%c7, %c0_40, %c0_41] : memref<9x8x4xbf16, #tpu.memory_space<vmem>>, vector<1x8x4xbf16>
    %54 = vector.shape_cast %53 : vector<1x8x4xbf16> to vector<8x4xbf16>
    %cst_42 = arith.constant dense<0.000000e+00> : vector<8x384xf32>
    %55 = tpu.matmul %54, %52, %cst_42 {dimension_numbers = #tpu.dot_dimension_numbers<[1], [0], [0], [1], [0, 0, 1, 1], [], []>} : vector<8x4xbf16>, vector<4x384xbf16>, vector<8x384xf32> -> vector<8x384xf32>
    %56 = arith.addf %49, %55 : vector<8x384xf32>
    %c0_43 = arith.constant 0 : index
    %c0_44 = arith.constant 0 : index
    %c38 = arith.constant 38 : index
    %57 = vector.load %arg1[%c0_43, %c0_44, %c38] : memref<1x4x512xf32, #tpu.memory_space<vmem>>, vector<1x4x384xf32>
    %58 = vector.shape_cast %57 : vector<1x4x384xf32> to vector<4x384xf32>
    %59 = arith.truncf %58 : vector<4x384xf32> to vector<4x384xbf16>
    %c8 = arith.constant 8 : index
    %c0_45 = arith.constant 0 : index
    %c0_46 = arith.constant 0 : index
    %60 = vector.load %arg2[%c8, %c0_45, %c0_46] : memref<9x8x4xbf16, #tpu.memory_space<vmem>>, vector<1x8x4xbf16>
    %61 = vector.shape_cast %60 : vector<1x8x4xbf16> to vector<8x4xbf16>
    %cst_47 = arith.constant dense<0.000000e+00> : vector<8x384xf32>
    %62 = tpu.matmul %61, %59, %cst_47 {dimension_numbers = #tpu.dot_dimension_numbers<[1], [0], [0], [1], [0, 0, 1, 1], [], []>} : vector<8x4xbf16>, vector<4x384xbf16>, vector<8x384xf32> -> vector<8x384xf32>
    %63 = arith.addf %56, %62 : vector<8x384xf32>
    %c0_48 = arith.constant 0 : index
    %c0_49 = arith.constant 0 : index
    %64 = vector.load %arg3[%c0_48, %c0_49] : memref<8x1xf32, #tpu.memory_space<vmem>>, vector<8x1xf32>
    %65 = vector.broadcast %64 : vector<8x1xf32> to vector<8x384xf32>
    %66 = arith.addf %63, %65 : vector<8x384xf32>
    %c0_50 = arith.constant 0 : index
    %c0_51 = arith.constant 0 : index
    %c0_52 = arith.constant 0 : index
    %67 = vector.load %arg4[%c0_50, %c0_51, %c0_52] : memref<1x8x384xf32, #tpu.memory_space<vmem>>, vector<1x8x384xf32>
    %68 = vector.shape_cast %67 : vector<1x8x384xf32> to vector<8x384xf32>
    %69 = vector.shape_cast %66 : vector<8x384xf32> to vector<1x8x384xf32>
    tpu.vector_store %arg4[%c0_50, %c0_51, %c0_52], %69 {strides = array<i32>} : memref<1x8x384xf32, #tpu.memory_space<vmem>>, vector<1x8x384xf32>,
    return
  }
  func.func @transform_0(%arg0: i32) -> (i32, i32, i32) {
    %c0_i32 = arith.constant 0 : i32
    %c0_i32_0 = arith.constant 0 : i32
    %c0_i32_1 = arith.constant 0 : i32
    return %arg0, %c0_i32, %c0_i32_0 : i32, i32, i32
  }
  func.func @transform_1(%arg0: i32) -> (i32, i32, i32) {
    %c0_i32 = arith.constant 0 : i32
    %c0_i32_0 = arith.constant 0 : i32
    %c0_i32_1 = arith.constant 0 : i32
    %c0_i32_2 = arith.constant 0 : i32
    return %c0_i32, %c0_i32_0, %c0_i32_1 : i32, i32, i32
  }
  func.func @transform_2(%arg0: i32) -> (i32, i32) {
    %c0_i32 = arith.constant 0 : i32
    %c0_i32_0 = arith.constant 0 : i32
    %c0_i32_1 = arith.constant 0 : i32
    return %c0_i32, %c0_i32_0 : i32, i32
  }
  func.func @transform_3(%arg0: i32) -> (i32, i32, i32) {
    %c0_i32 = arith.constant 0 : i32
    %c0_i32_0 = arith.constant 0 : i32
    %c0_i32_1 = arith.constant 0 : i32
    return %arg0, %c0_i32, %c0_i32_0 : i32, i32, i32
  }
}

</mosaic_0001>

<bundles_post_ra>
// kernel: basic_conv2d.1
= control target key start
LH: loop header
LB: loop body
LE: loop exit
PB: predicated region body
PF: predicated region fallthrough
CT: control target
= control target key end

     0   :  { %s1528_s12 = smov 0   ;;  %s1677_s0 = inlined_call_operand.vmem [shape: f32[2,4,512], index: 0, kind: input, shape index: {}]   ;;  %s1678_s1 = inlined_call_operand.vmem [shape: bf16[9,8,4], index: 1, kind: input, shape index: {}]   ;;  %s1679_s2 = inlined_call_operand.vmem [shape: f32[8,1], index: 2, kind: input, shape index: {}]   ;;  %s1680_s3 = inlined_call_operand.vmem [shape: f32[2,8,384], index: 3, kind: output, shape index: {}]  }
   0x1 LB: > { %s1348_s13 = sadd.s32 4294967295, %s1495_s12   ;;  %p1352_p0 = scmp.ge.s32.totalorder %s1495_s12, 1  ;;  %s1495_s12 = sphi %s1528_s12, %s13_s12  }
   0x2   : > { %p137_p1 = scmp.lt.s32.totalorder %s1495_s12, 3 }
   0x4   : > { %p138_p2 = pnand %p1352_p0, %p137_p1 }
   0x5   : > { %p161_p3 = scmp.lt.s32.totalorder (!%p138_p2), %s1348_s13, 1  ;;  %v1497_v0 = vmov (!%p138_p2), 0.0   ;;  %v1498_v1 = vmov (!%p138_p2), 0   ;;  %vm1499_vm0 = vmmov (!%p138_p2), 0   ;;  %s1500_s18 = smov (!%p138_p2), 127   ;;  %v1281_v10 = vld [vmem:[%s1679_s2] sm:$0xff] (!%p138_p2) }
   0x6   : > { %141 = sbr.rel (%p138_p2) target bundleno = 425 (0x1a9), region = 32  ;;  %1412 = vmatprep.subr.bf16.mxu1 (!%p138_p2), %v1497_v0  ;;  %257 = vmatprep.mubr.bf16.mxu0 (!%p138_p2), %v1498_v1  ;;  %s1501_s19 = smov (!%p138_p2), 126   ;;  %vm207_vm1 = vcmask (!%p138_p2), 1039360   ;;  %vm215_vm2 = vcmask (!%p138_p2), 1041408   ;;  %v1356_v22 = vld [vmem:[%s1678_s1 + $0x4] sm:$0xf] (!%p138_p2) }
   0x7   : > { %1414 = vmatprep.mubr.msk.bf16.mxu1 (!%p138_p2), %vm1499_vm0, %v1497_v0  ;;  %1486 = vset.pattern.permute.xlu0 (!%p138_p2), %v1498_v1  ;;  %s1502_s20 = smov (!%p138_p2), 110   ;;  %s1503_s21 = smov (!%p138_p2), 109   ;;  %vm211_vm3 = vcmask (!%p138_p2), 31744   ;;  %vm425_vm4 = vcmask (!%p138_p2), 1031168   ;;  %v180_v32 = vld [vmem:[%s1678_s1] sm:$0xf] (!%p138_p2) }
   0x8   : > { %s1504_s22 = smov (!%p138_p2), 108   ;;  %s1505_s23 = smov (!%p138_p2), 92   ;;  %vm551_vm5 = vcmask (!%p138_p2), 900096   ;;  %v1363_v42 = vld [vmem:[%s1678_s1 + $0x8] sm:$0xf] (!%p138_p2)  ;;  %vm677_vm6 = vcmask (!%p138_p2), 891904  }
   0x9   : > { %s1506_s24 = smov (!%p138_p2), 91   ;;  %s1507_s25 = smov (!%p138_p2), 90   ;;  %v1367_v52 = vld [vmem:[%s1678_s1 + $0xc] sm:$0xf] (!%p138_p2)  ;;  %vm803_vm7 = vcmask (!%p138_p2), 883712   ;;  %vm929_vm8 = vcmask (!%p138_p2), 752640  }
   0xa   : > { %v1371_v62 = vld [vmem:[%s1678_s1 + $0x10] sm:$0xf] (!%p138_p2)  ;;  %vm1055_vm9 = vcmask (!%p138_p2), 744448   ;;  %vm1181_vm10 = vcmask (!%p138_p2), 736256  }
   0xd   : > { %s1682_s13 = smov (!%p161_p3, %s1348_s13), 1 }
   0xe   : > { %s1393_s14 = sshll.u32 %s1682_s13, 4 }
   0xf   : > { %s1547_s17 = scalar_lea.vmem %s1677_s0, %s1393_s14 }
  0x10   : > { %v182_v2 = vld [vmem:[%s1547_s17 + $0x8] sm:$0xff]  ;;  %v181_v3 = vld [vmem:[%s1547_s17] sm:$0xff] }
  0x11   : > { %v191_v4 = vpack.c.bf16 %v182_v2, %v182_v2  ;;  %v186_v5 = vcombine.high %v182_v2, %v182_v2  ;;  %v1551_v6 = vpack.c.bf16 %v181_v3, %v181_v3  ;;  %v185_v7 = vcombine.high %v181_v3, %v181_v3  ;;  %v173_v13 = vld [vmem:[%s1547_s17 + $0x8] sm:$0xf] }
  0x12   : > { %v179_v16 = vpack.c.bf16 %v173_v13, %v173_v13 }
  0x13   : > { %203 = vrot.lane.b32.xlu1 %v191_v4, %s1500_s18  ;;  %199 = vrot.lane.b32.xlu0 %v1551_v6, %s1500_s18  ;;  %v192_v8 = vpack.c.bf16 %v186_v5, %v186_v5  ;;  %v190_v9 = vpack.c.bf16 %v185_v7, %v185_v7  ;;  %v310_v24 = vsel %vm215_vm2, %v1551_v6, 0 }
  0x14   : > { %v316_v26 = vsel %vm215_vm2, %v179_v16, 0 }
  0x17   : > { %205 = vrot.lane.b32.xlu1 %v192_v8, %s1500_s18  ;;  %201 = vrot.lane.b32.xlu0 %v190_v9, %s1500_s18 }
  0x1b   : > { %417 = vrot.lane.b32.xlu0 %v1551_v6, %s1501_s19  ;;  %419 = vrot.lane.b32.xlu1 %v190_v9, %s1501_s19 }
  0x1f   : > { %421 = vrot.lane.b32.xlu0 %v191_v4, %s1501_s19  ;;  %423 = vrot.lane.b32.xlu1 %v192_v8, %s1501_s19 }
  0x23   : > { %543 = vrot.lane.b32.xlu0 %v1551_v6, %s1502_s20  ;;  %545 = vrot.lane.b32.xlu1 %v190_v9, %s1502_s20 }
  0x27   : > { %547 = vrot.lane.b32.xlu0 %v191_v4, %s1502_s20  ;;  %549 = vrot.lane.b32.xlu1 %v192_v8, %s1502_s20 }
  0x2b   : > { %669 = vrot.lane.b32.xlu0 %v1551_v6, %s1503_s21  ;;  %671 = vrot.lane.b32.xlu1 %v190_v9, %s1503_s21 }
  0x2f   : > { %673 = vrot.lane.b32.xlu0 %v191_v4, %s1503_s21  ;;  %675 = vrot.lane.b32.xlu1 %v192_v8, %s1503_s21  ;;  %s1466_s21 = smul.u32 24, %s1682_s13 }
  0x33   : > { %795 = vrot.lane.b32.xlu0 %v1551_v6, %s1504_s22  ;;  %797 = vrot.lane.b32.xlu1 %v190_v9, %s1504_s22 }
  0x37   : > { %799 = vrot.lane.b32.xlu0 %v191_v4, %s1504_s22  ;;  %801 = vrot.lane.b32.xlu1 %v192_v8, %s1504_s22 }
  0x3b   : > { %921 = vrot.lane.b32.xlu0 %v1551_v6, %s1505_s23  ;;  %923 = vrot.lane.b32.xlu1 %v190_v9, %s1505_s23 }
  0x3f   : > { %925 = vrot.lane.b32.xlu0 %v191_v4, %s1505_s23  ;;  %927 = vrot.lane.b32.xlu1 %v192_v8, %s1505_s23 }
  0x43   : > { %1047 = vrot.lane.b32.xlu0 %v1551_v6, %s1506_s24  ;;  %1049 = vrot.lane.b32.xlu1 %v190_v9, %s1506_s24 }
  0x47   : > { %1051 = vrot.lane.b32.xlu0 %v191_v4, %s1506_s24  ;;  %1053 = vrot.lane.b32.xlu1 %v192_v8, %s1506_s24  ;;  %s170_s24 = scalar_lea.vmem %s1680_s3, %s1466_s21 }
  0x4b   : > { %1173 = vrot.lane.b32.xlu0 %v1551_v6, %s1507_s25  ;;  %1175 = vrot.lane.b32.xlu1 %v190_v9, %s1507_s25 }
  0x4f   : > { %1177 = vrot.lane.b32.xlu0 %v191_v4, %s1507_s25  ;;  %1179 = vrot.lane.b32.xlu1 %v192_v8, %s1507_s25 }
  0x53   : > { %1284 = vperm.xlu0 %1486, %v1281_v10   ;;  %v1375_v10 = vld [vmem:[%s1678_s1 + $0x14] sm:$0xf] }
  0x85   : > { %v204_v11 = vpop.permute.xlu1 %203  ;;  %v200_v12 = vpop.permute.xlu0 %199 }
  0x89   : > { %v206_v14 = vpop.permute.xlu1 %205  ;;  %v202_v15 = vpop.permute.xlu0 %201 }
  0x8a   : > { %v209_v17 = vsel %vm207_vm1, %v202_v15, %v204_v11  ;;  %v208_v18 = vsel %vm207_vm1, %v200_v12, %v202_v15  ;;  %v210_v19 = vsel %vm207_vm1, %v204_v11, %v206_v14 }
  0x8b   : > { %1357 = vmatprep.subr.msk.bf16.mxu0 %vm215_vm2, %v209_v17  ;;  %v217_v20 = vsel %vm215_vm2, %v208_v18, 0  ;;  %v223_v21 = vsel %vm215_vm2, %v210_v19, 0 }
  0x8c   : > { %226 = vmatpush1.bf16.msra.mxu0 %v217_v20  ;;  %1413 = vmatpush3.bf16.msra.mxu1 %v223_v21  ;;  %v1379_v20 = vld [vmem:[%s1678_s1 + $0x18] sm:$0xf] }
  0x8d   : > { %v418_v23 = vpop.permute.xlu0 %417  ;;  %1360 = vmatprep.subr.msk.bf16.mxu0 %vm215_vm2, %v190_v9  ;;  %1418 = vmatprep.subr.bf16.mxu1 %v1497_v0  ;;  %v420_v25 = vpop.permute.xlu1 %419 }
  0x8e   : > { %v426_v29 = vsel %vm425_vm4, %v418_v23, %v420_v25 }
  0x8f   : > { %1358 = vmatmul.mubr.msk.bf16.vlgmr.msra.gmra.mrb[0].mxu0 %vm211_vm3, %v1356_v22  ;;  %1415 = vmatmul.mubr.msk.bf16.vlgmr.msra.gmra.mrb[0].mxu1 %vm211_vm3, %v1356_v22  ;;  %v433_v33 = vsel %vm215_vm2, %v426_v29, 0 }
  0x90   : > { %319 = vmatpush1.bf16.msra.mxu0 %v310_v24  ;;  %1419 = vmatpush3.bf16.msra.mxu1 %v316_v26 }
  0x91   : > { %v422_v27 = vpop.permute.xlu0 %421  ;;  %v424_v28 = vpop.permute.xlu1 %423  ;;  %350 = vmatprep.mubr.bf16.mxu0 %v1498_v1  ;;  %1420 = vmatprep.mubr.msk.bf16.mxu1 %vm1499_vm0, %v1497_v0 }
  0x92   : > { %v427_v30 = vsel %vm425_vm4, %v420_v25, %v422_v27  ;;  %v428_v31 = vsel %vm425_vm4, %v422_v27, %v424_v28  ;;  %1424 = vmatprep.subr.bf16.mxu1 %v1497_v0 }
  0x93   : > { %1364 = vmatprep.subr.msk.bf16.mxu0 %vm215_vm2, %v427_v30  ;;  %v439_v34 = vsel %vm215_vm2, %v428_v31, 0  ;;  %v1383_v30 = vld [vmem:[%s1678_s1 + $0x1c] sm:$0xf] }
  0x95   : > { %v544_v35 = vpop.permute.xlu0 %543  ;;  %v546_v36 = vpop.permute.xlu1 %545 }
  0x96   : > { %v552_v39 = vsel %vm551_vm5, %v544_v35, %v546_v36 }
  0x97   : > { %1361 = vmatmul.mubr.msk.bf16.vlgmr.msra.gmra.mrb[4].mxu0 %vm211_vm3, %v180_v32  ;;  %1421 = vmatmul.mubr.msk.bf16.vlgmr.msra.gmra.mrb[4].mxu1 %vm211_vm3, %v180_v32  ;;  %v559_v43 = vsel %vm215_vm2, %v552_v39, 0 }
  0x98   : > { %442 = vmatpush1.bf16.msra.mxu0 %v433_v33  ;;  %1425 = vmatpush3.bf16.msra.mxu1 %v439_v34  ;;  %v1387_v33 = vld [vmem:[%s1678_s1 + $0x20] sm:$0xf] }
  0x99   : > { %v548_v37 = vpop.permute.xlu0 %547  ;;  %v550_v38 = vpop.permute.xlu1 %549  ;;  %473 = vmatprep.mubr.bf16.mxu0 %v1498_v1  ;;  %1426 = vmatprep.mubr.msk.bf16.mxu1 %vm1499_vm0, %v1497_v0 }
  0x9a   : > { %v553_v40 = vsel %vm551_vm5, %v546_v36, %v548_v37  ;;  %v554_v41 = vsel %vm551_vm5, %v548_v37, %v550_v38  ;;  %1430 = vmatprep.subr.bf16.mxu1 %v1497_v0 }
  0x9b   : > { %1368 = vmatprep.subr.msk.bf16.mxu0 %vm215_vm2, %v553_v40  ;;  %v565_v44 = vsel %vm215_vm2, %v554_v41, 0 }
  0x9d   : > { %v670_v45 = vpop.permute.xlu0 %669  ;;  %v672_v46 = vpop.permute.xlu1 %671 }
  0x9e   : > { %v678_v49 = vsel %vm677_vm6, %v670_v45, %v672_v46 }
  0x9f   : > { %1365 = vmatmul.mubr.msk.bf16.vlgmr.msra.gmra.mrb[8].mxu0 %vm211_vm3, %v1363_v42  ;;  %1427 = vmatmul.mubr.msk.bf16.vlgmr.msra.gmra.mrb[8].mxu1 %vm211_vm3, %v1363_v42  ;;  %v685_v53 = vsel %vm215_vm2, %v678_v49, 0 }
  0xa0   : > { %568 = vmatpush1.bf16.msra.mxu0 %v559_v43  ;;  %1431 = vmatpush3.bf16.msra.mxu1 %v565_v44 }
  0xa1   : > { %v674_v47 = vpop.permute.xlu0 %673  ;;  %v676_v48 = vpop.permute.xlu1 %675  ;;  %599 = vmatprep.mubr.bf16.mxu0 %v1498_v1  ;;  %1432 = vmatprep.mubr.msk.bf16.mxu1 %vm1499_vm0, %v1497_v0 }
  0xa2   : > { %v679_v50 = vsel %vm677_vm6, %v672_v46, %v674_v47  ;;  %v680_v51 = vsel %vm677_vm6, %v674_v47, %v676_v48  ;;  %1436 = vmatprep.subr.bf16.mxu1 %v1497_v0 }
  0xa3   : > { %1372 = vmatprep.subr.msk.bf16.mxu0 %vm215_vm2, %v679_v50  ;;  %v691_v54 = vsel %vm215_vm2, %v680_v51, 0 }
  0xa5   : > { %v796_v55 = vpop.permute.xlu0 %795  ;;  %v798_v56 = vpop.permute.xlu1 %797 }
  0xa6   : > { %v804_v59 = vsel %vm803_vm7, %v796_v55, %v798_v56 }
  0xa7   : > { %1369 = vmatmul.mubr.msk.bf16.vlgmr.msra.gmra.mrb[12].mxu0 %vm211_vm3, %v1367_v52  ;;  %1433 = vmatmul.mubr.msk.bf16.vlgmr.msra.gmra.mrb[12].mxu1 %vm211_vm3, %v1367_v52  ;;  %v811_v63 = vsel %vm215_vm2, %v804_v59, 0 }
  0xa8   : > { %694 = vmatpush1.bf16.msra.mxu0 %v685_v53  ;;  %1437 = vmatpush3.bf16.msra.mxu1 %v691_v54 }
  0xa9   : > { %v800_v57 = vpop.permute.xlu0 %799  ;;  %v802_v58 = vpop.permute.xlu1 %801  ;;  %725 = vmatprep.mubr.bf16.mxu0 %v1498_v1  ;;  %1438 = vmatprep.mubr.msk.bf16.mxu1 %vm1499_vm0, %v1497_v0 }
  0xaa   : > { %v805_v60 = vsel %vm803_vm7, %v798_v56, %v800_v57  ;;  %v806_v61 = vsel %vm803_vm7, %v800_v57, %v802_v58  ;;  %1442 = vmatprep.subr.bf16.mxu1 %v1497_v0 }
  0xab   : > { %1376 = vmatprep.subr.msk.bf16.mxu0 %vm215_vm2, %v805_v60  ;;  %v817_v2 = vsel %vm215_vm2, %v806_v61, 0 }
  0xad   : > { %v922_v3 = vpop.permute.xlu0 %921  ;;  %v924_v4 = vpop.permute.xlu1 %923 }
  0xae   : > { %v930_v7 = vsel %vm929_vm8, %v922_v3, %v924_v4 }
  0xaf   : > { %1373 = vmatmul.mubr.msk.bf16.vlgmr.msra.gmra.mrb[16].mxu0 %vm211_vm3, %v1371_v62  ;;  %1439 = vmatmul.mubr.msk.bf16.vlgmr.msra.gmra.mrb[16].mxu1 %vm211_vm3, %v1371_v62  ;;  %v937_v11 = vsel %vm215_vm2, %v930_v7, 0 }
  0xb0   : > { %820 = vmatpush1.bf16.msra.mxu0 %v811_v63  ;;  %1443 = vmatpush3.bf16.msra.mxu1 %v817_v2 }
  0xb1   : > { %v926_v5 = vpop.permute.xlu0 %925  ;;  %v928_v6 = vpop.permute.xlu1 %927  ;;  %851 = vmatprep.mubr.bf16.mxu0 %v1498_v1  ;;  %1444 = vmatprep.mubr.msk.bf16.mxu1 %vm1499_vm0, %v1497_v0 }
  0xb2   : > { %v931_v8 = vsel %vm929_vm8, %v924_v4, %v926_v5  ;;  %v932_v9 = vsel %vm929_vm8, %v926_v5, %v928_v6  ;;  %1448 = vmatprep.subr.bf16.mxu1 %v1497_v0 }
  0xb3   : > { %1380 = vmatprep.subr.msk.bf16.mxu0 %vm215_vm2, %v931_v8  ;;  %v943_v12 = vsel %vm215_vm2, %v932_v9, 0 }
  0xb5   : > { %v1048_v13 = vpop.permute.xlu0 %1047  ;;  %v1050_v14 = vpop.permute.xlu1 %1049 }
  0xb6   : > { %v1056_v17 = vsel %vm1055_vm9, %v1048_v13, %v1050_v14 }
  0xb7   : > { %1377 = vmatmul.mubr.msk.bf16.vlgmr.msra.gmra.mrb[20].mxu0 %vm211_vm3, %v1375_v10  ;;  %1445 = vmatmul.mubr.msk.bf16.vlgmr.msra.gmra.mrb[20].mxu1 %vm211_vm3, %v1375_v10  ;;  %v1063_v21 = vsel %vm215_vm2, %v1056_v17, 0 }
  0xb8   : > { %946 = vmatpush1.bf16.msra.mxu0 %v937_v11  ;;  %1449 = vmatpush3.bf16.msra.mxu1 %v943_v12 }
  0xb9   : > { %v1052_v15 = vpop.permute.xlu0 %1051  ;;  %v1054_v16 = vpop.permute.xlu1 %1053  ;;  %977 = vmatprep.mubr.bf16.mxu0 %v1498_v1  ;;  %1450 = vmatprep.mubr.msk.bf16.mxu1 %vm1499_vm0, %v1497_v0 }
  0xba   : > { %v1057_v18 = vsel %vm1055_vm9, %v1050_v14, %v1052_v15  ;;  %v1058_v19 = vsel %vm1055_vm9, %v1052_v15, %v1054_v16  ;;  %1454 = vmatprep.subr.bf16.mxu1 %v1497_v0 }
  0xbb   : > { %1384 = vmatprep.subr.msk.bf16.mxu0 %vm215_vm2, %v1057_v18  ;;  %v1069_v22 = vsel %vm215_vm2, %v1058_v19, 0 }
  0xbd   : > { %v1174_v23 = vpop.permute.xlu0 %1173  ;;  %v1176_v24 = vpop.permute.xlu1 %1175 }
  0xbe   : > { %v1182_v27 = vsel %vm1181_vm10, %v1174_v23, %v1176_v24 }
  0xbf   : > { %1381 = vmatmul.mubr.msk.bf16.vlgmr.msra.gmra.mrb[24].mxu0 %vm211_vm3, %v1379_v20  ;;  %1451 = vmatmul.mubr.msk.bf16.vlgmr.msra.gmra.mrb[24].mxu1 %vm211_vm3, %v1379_v20  ;;  %v1189_v31 = vsel %vm215_vm2, %v1182_v27, 0 }
  0xc0   : > { %1072 = vmatpush1.bf16.msra.mxu0 %v1063_v21  ;;  %1455 = vmatpush3.bf16.msra.mxu1 %v1069_v22 }
  0xc1   : > { %v1178_v25 = vpop.permute.xlu0 %1177  ;;  %v1180_v26 = vpop.permute.xlu1 %1179  ;;  %1103 = vmatprep.mubr.bf16.mxu0 %v1498_v1  ;;  %1456 = vmatprep.mubr.msk.bf16.mxu1 %vm1499_vm0, %v1497_v0 }
  0xc2   : > { %v1183_v28 = vsel %vm1181_vm10, %v1176_v24, %v1178_v25  ;;  %v1184_v29 = vsel %vm1181_vm10, %v1178_v25, %v1180_v26  ;;  %1460 = vmatprep.subr.bf16.mxu1 %v1497_v0 }
  0xc3   : > { %1388 = vmatprep.subr.msk.bf16.mxu0 %vm215_vm2, %v1183_v28  ;;  %v1195_v32 = vsel %vm215_vm2, %v1184_v29, 0 }
  0xc7   : > { %1385 = vmatmul.mubr.msk.bf16.vlgmr.msra.gmra.mrb[28].mxu0 %vm211_vm3, %v1383_v30  ;;  %1457 = vmatmul.mubr.msk.bf16.vlgmr.msra.gmra.mrb[28].mxu1 %vm211_vm3, %v1383_v30 }
  0xc8   : > { %1198 = vmatpush1.bf16.msra.mxu0 %v1189_v31  ;;  %1461 = vmatpush3.bf16.msra.mxu1 %v1195_v32 }
  0xc9   : > { %1229 = vmatprep.mubr.bf16.mxu0 %v1498_v1  ;;  %1462 = vmatprep.mubr.msk.bf16.mxu1 %vm1499_vm0, %v1497_v0 }
  0xcf   : > { %1389 = vmatmul.mubr.msk.bf16.vlgmr.msra.gmra.mrb[32].mxu0 %vm211_vm3, %v1387_v33  ;;  %1463 = vmatmul.mubr.msk.bf16.vlgmr.msra.gmra.mrb[32].mxu1 %vm211_vm3, %v1387_v33 }
 0x162   : > { %v259_v34 = vpop.f32.mrb[0].mxu0  ;;  %v300_v35 = vpop.f32.mrb[0].mxu1 }
 0x163   : > { %v261_v36 = vpop.f32.mrb[1].mxu0  ;;  %v1416_v37 = vpop.f32.mrb[1].mxu1 }
 0x164   : > { %v263_v38 = vpop.f32.mrb[2].mxu0  ;;  %v303_v39 = vpop.f32.mrb[2].mxu1 }
 0x165   : > { %v264_v40 = vpop.f32.mrb[3].mxu0  ;;  %v1417_v41 = vpop.f32.mrb[3].mxu1 }
 0x16a   : > { %v352_v1 = vpop.f32.mrb[4].mxu0  ;;  %v393_v42 = vpop.f32.mrb[4].mxu1 }
 0x16b   : > { %v353_v43 = vadd.f32 %v352_v1, %v259_v34  ;;  %v394_v0 = vadd.f32 %v393_v42, %v300_v35  ;;  %v354_v44 = vpop.f32.mrb[5].mxu0  ;;  %v1422_v45 = vpop.f32.mrb[5].mxu1 }
 0x16c   : > { %v355_v46 = vadd.f32 %v354_v44, %v261_v36  ;;  %v356_v47 = vpop.f32.mrb[6].mxu0  ;;  %v396_v48 = vpop.f32.mrb[6].mxu1 }
 0x16d   : > { %v357_v49 = vpop.f32.mrb[7].mxu0  ;;  %v1423_v50 = vpop.f32.mrb[7].mxu1 }
 0x172   : > { %v475_v51 = vpop.f32.mrb[8].mxu0  ;;  %v516_v52 = vpop.f32.mrb[8].mxu1 }
 0x173   : > { %v522_v53 = vadd.f32 %v475_v51, %v353_v43  ;;  %v524_v54 = vadd.f32 %v516_v52, %v394_v0  ;;  %v477_v55 = vpop.f32.mrb[9].mxu0  ;;  %v1428_v56 = vpop.f32.mrb[9].mxu1 }
 0x174   : > { %v523_v57 = vadd.f32 %v477_v55, %v355_v46  ;;  %v479_v58 = vpop.f32.mrb[10].mxu0  ;;  %v519_v59 = vpop.f32.mrb[10].mxu1 }
 0x175   : > { %v480_v60 = vpop.f32.mrb[11].mxu0  ;;  %v1429_v61 = vpop.f32.mrb[11].mxu1 }
 0x17a   : > { %v601_v62 = vpop.f32.mrb[12].mxu0  ;;  %v642_v63 = vpop.f32.mrb[12].mxu1 }
 0x17b   : > { %v648_v2 = vadd.f32 %v601_v62, %v522_v53  ;;  %v650_v3 = vadd.f32 %v642_v63, %v524_v54  ;;  %v603_v4 = vpop.f32.mrb[13].mxu0  ;;  %v1434_v5 = vpop.f32.mrb[13].mxu1 }
 0x17c   : > { %v649_v6 = vadd.f32 %v603_v4, %v523_v57  ;;  %v605_v7 = vpop.f32.mrb[14].mxu0  ;;  %v645_v8 = vpop.f32.mrb[14].mxu1 }
 0x17d   : > { %v606_v9 = vpop.f32.mrb[15].mxu0  ;;  %v1435_v10 = vpop.f32.mrb[15].mxu1 }
 0x17e   : > { %v1285_v53 = vpop.permute.xlu0 %1284 }
 0x182   : > { %v727_v11 = vpop.f32.mrb[16].mxu0  ;;  %v768_v12 = vpop.f32.mrb[16].mxu1 }
 0x183   : > { %v774_v13 = vadd.f32 %v727_v11, %v648_v2  ;;  %v776_v14 = vadd.f32 %v768_v12, %v650_v3  ;;  %v729_v15 = vpop.f32.mrb[17].mxu0  ;;  %v1440_v16 = vpop.f32.mrb[17].mxu1 }
 0x184   : > { %v775_v17 = vadd.f32 %v729_v15, %v649_v6  ;;  %v731_v18 = vpop.f32.mrb[18].mxu0  ;;  %v771_v19 = vpop.f32.mrb[18].mxu1 }
 0x185   : > { %v732_v20 = vpop.f32.mrb[19].mxu0  ;;  %v1441_v21 = vpop.f32.mrb[19].mxu1 }
 0x18a   : > { %v853_v22 = vpop.f32.mrb[20].mxu0  ;;  %v894_v23 = vpop.f32.mrb[20].mxu1 }
 0x18b   : > { %v900_v24 = vadd.f32 %v853_v22, %v774_v13  ;;  %v902_v25 = vadd.f32 %v894_v23, %v776_v14  ;;  %v855_v26 = vpop.f32.mrb[21].mxu0  ;;  %v1446_v27 = vpop.f32.mrb[21].mxu1 }
 0x18c   : > { %v901_v28 = vadd.f32 %v855_v26, %v775_v17  ;;  %v857_v29 = vpop.f32.mrb[22].mxu0  ;;  %v897_v30 = vpop.f32.mrb[22].mxu1 }
 0x18d   : > { %v858_v31 = vpop.f32.mrb[23].mxu0  ;;  %v1447_v32 = vpop.f32.mrb[23].mxu1 }
 0x192   : > { %v979_v33 = vpop.f32.mrb[24].mxu0  ;;  %v1020_v34 = vpop.f32.mrb[24].mxu1 }
 0x193   : > { %v1026_v35 = vadd.f32 %v979_v33, %v900_v24  ;;  %v1028_v36 = vadd.f32 %v1020_v34, %v902_v25  ;;  %v981_v37 = vpop.f32.mrb[25].mxu0  ;;  %v1452_v38 = vpop.f32.mrb[25].mxu1 }
 0x194   : > { %v1027_v39 = vadd.f32 %v981_v37, %v901_v28  ;;  %v983_v40 = vpop.f32.mrb[26].mxu0  ;;  %v1023_v41 = vpop.f32.mrb[26].mxu1 }
 0x195   : > { %v984_v1 = vpop.f32.mrb[27].mxu0  ;;  %v1453_v42 = vpop.f32.mrb[27].mxu1 }
 0x19a   : > { %v1105_v43 = vpop.f32.mrb[28].mxu0  ;;  %v1146_v0 = vpop.f32.mrb[28].mxu1 }
 0x19b   : > { %v1152_v44 = vadd.f32 %v1105_v43, %v1026_v35  ;;  %v1154_v45 = vadd.f32 %v1146_v0, %v1028_v36  ;;  %v1107_v46 = vpop.f32.mrb[29].mxu0  ;;  %v1458_v47 = vpop.f32.mrb[29].mxu1 }
 0x19c   : > { %v1153_v48 = vadd.f32 %v1107_v46, %v1027_v39  ;;  %v1109_v49 = vpop.f32.mrb[30].mxu0  ;;  %v1149_v50 = vpop.f32.mrb[30].mxu1 }
 0x19d   : > { %v1110_v51 = vpop.f32.mrb[31].mxu0  ;;  %v1459_v52 = vpop.f32.mrb[31].mxu1 }
 0x1a2   : > { %v1231_v54 = vpop.f32.mrb[32].mxu0  ;;  %v1272_v55 = vpop.f32.mrb[32].mxu1 }
 0x1a3   : > { %v1278_v56 = vadd.f32 %v1231_v54, %v1152_v44  ;;  %v1280_v57 = vadd.f32 %v1272_v55, %v1154_v45  ;;  %v1233_v58 = vpop.f32.mrb[33].mxu0  ;;  %v1464_v59 = vpop.f32.mrb[33].mxu1 }
 0x1a4   : > { %v1279_v60 = vadd.f32 %v1233_v58, %v1153_v48  ;;  %v1235_v61 = vpop.f32.mrb[34].mxu0  ;;  %v1275_v62 = vpop.f32.mrb[34].mxu1 }
 0x1a5   : > { %v1287_v63 = vadd.f32 %v1285_v53, %v1278_v56  ;;  %v1289_v2 = vadd.f32 %v1285_v53, %v1280_v57  ;;  %v1236_v3 = vpop.f32.mrb[35].mxu0  ;;  %v1465_v4 = vpop.f32.mrb[35].mxu1 }
 0x1a6   : > { %v1288_v5 = vadd.f32 %v1285_v53, %v1279_v60 }
 0x1a7   : > { %1290 = vst [vmem:[%s170_s24] sm:$0xff] %v1287_v63  ;;  %1292 = vst [vmem:[%s170_s24 + $0x10] sm:$0xff] %v1289_v2 }
 0x1a8   : > { %1291 = vst [vmem:[%s170_s24 + $0x8] sm:$0xff] %v1288_v5 }
 0x1a9 PF: > { %s13_s12 = sadd.s32 1, %s1495_s12  }
 0x1aa   : > { %p10_p4 = scmp.ge.s32.totalorder %s13_s12, 4  }
 0x1ac   :  { %12 = sbr.rel (!%p10_p4) target bundleno = 1 (0x1), region = 70 }

</bundles_post_ra>
